<compile_context>
chip_gen: v6e
topology: v6e:2x2x1
jax: 0.10.0
libtpu: 0.0.40
codegen_flags: <defaults>
</compile_context>

<pallas_src>
import jax
import jax.numpy as jnp
from jax.experimental import pallas as pl
from jax.experimental.pallas import tpu as pltpu

INPUT_DIM = 128      # forward() hard-codes reshape(-1, 256) => input_dim = 128
ENCODING_DIM = 64    # free hyperparameter; encoding_dim // 2 = 32

# Batch-tile size.  Per-row VMEM cost is ~2.25 KiB (in + enc + dec blocks,
# f32), doubled by pipelining, plus ~0.3 MiB of resident combined weights.
# 1024 rows (~5-6 MiB) fits under every generation's default scoped VMEM
# (v5e 16 MiB / v6e 32 MiB / v7x 32 MiB).  Per-generation sweep guidance:
#   v5e: 1024-2048, v6e: 4096-8192 (raise vmem_limit_bytes), v7x: 2048-4096.
DEFAULT_BLOCK_B = 1024


def _round_up(n, m):
    return ((n + m - 1) // m) * m


def _autoencoder_kernel(x_ref,
                        w1, b1, w2, b2, w3, b3, w4, b4,
                        enc_ref, dec_ref):
    """Fused 4-layer complex autoencoder forward on one batch tile.

    Each layer is a single matmul against the combined complex weight.
    """
    mm_dtype = w1.dtype                 # f32, or bf16 when use_bf16=True
    x = x_ref[...].astype(mm_dtype)                                   # [TB, 256]

    # encoder: ComplexLinear(128, 64) -> ReLU -> ComplexLinear(64, 32)
    h = jnp.dot(x, w1[...], preferred_element_type=jnp.float32) + b1[...]
    h = jnp.maximum(h, 0.0)
    enc = jnp.dot(h.astype(mm_dtype), w2[...],
                  preferred_element_type=jnp.float32) + b2[...]       # [TB, 64]
    # enc last dim is 64 (<128) -> masked vst; only 256 B/row so accepted.
    enc_ref[...] = enc

    # decoder: ComplexLinear(32, 64) -> ReLU -> ComplexLinear(64, 128)
    d = jnp.dot(enc.astype(mm_dtype), w3[...],
                preferred_element_type=jnp.float32) + b3[...]
    d = jnp.maximum(d, 0.0)
    dec = jnp.dot(d.astype(mm_dtype), w4[...],
                  preferred_element_type=jnp.float32) + b4[...]       # [TB, 256]
    dec_ref[...] = dec


def init_params(key, input_dim=INPUT_DIM, encoding_dim=ENCODING_DIM):
    """Deterministic init mimicking nn.Linear's U(-1/sqrt(fan_in), +)."""
    dims = [(input_dim, encoding_dim),          # encoder layer 1
            (encoding_dim, encoding_dim // 2),  # encoder layer 2
            (encoding_dim // 2, encoding_dim),  # decoder layer 1
            (encoding_dim, input_dim)]          # decoder layer 2
    params = []
    for (fi, fo) in dims:
        key, k1, k2, k3, k4 = jax.random.split(key, 5)
        bound = 1.0 / (fi ** 0.5)
        wr = jax.random.uniform(k1, (fi, fo), jnp.float32, -bound, bound)
        wi = jax.random.uniform(k2, (fi, fo), jnp.float32, -bound, bound)
        br = jax.random.uniform(k3, (fo,), jnp.float32, -bound, bound)
        bi = jax.random.uniform(k4, (fo,), jnp.float32, -bound, bound)
        params.append((wr, wi, br, bi))
    return params


def _combine_params(params, use_bf16):
    """Fold (wr, wi, br, bi) into one [2*in, 2*out] weight + [1, 2*out] bias.

    out = [x_r, x_i] @ [[wr, wi], [-wi, wr]] + [br - bi, br + bi]
        == concat(fc_r(x_r) - fc_i(x_i), fc_r(x_i) + fc_i(x_r))
    """
    flat = []
    for (wr, wi, br, bi) in params:
        wc = jnp.block([[wr, wi], [-wi, wr]]).astype(jnp.float32)
        bc = jnp.concatenate([br - bi, br + bi]).reshape(1, -1).astype(jnp.float32)
        if use_bf16:
            wc = wc.astype(jnp.bfloat16)
        flat += [wc, bc]
    return flat


def complex_autoencoder(x, params, *, input_dim=INPUT_DIM,
                        encoding_dim=ENCODING_DIM,
                        block_b=DEFAULT_BLOCK_B, use_bf16=False):
    x2 = x.reshape(-1, 2 * input_dim).astype(jnp.float32)   # x.reshape(-1, 256)
    B = x2.shape[0]

    # Pick the batch tile and pad B to a multiple of it (rows are independent;
    # zero padding is harmless and sliced away afterwards).
    tb = min(block_b, _round_up(B, 8))
    Bp = _round_up(B, tb)
    if Bp != B:
        x2 = jnp.pad(x2, ((0, Bp - B), (0, 0)))

    flat = _combine_params(params, use_bf16)

    # Weights/biases: whole-array blocks, constant index_map => VMEM-resident.
    w_specs = [pl.BlockSpec(p.shape, lambda i: (0, 0)) for p in flat]
    in_specs = [pl.BlockSpec((tb, 2 * input_dim), lambda i: (i, 0))] + w_specs
    out_specs = (pl.BlockSpec((tb, encoding_dim), lambda i: (i, 0)),
                 pl.BlockSpec((tb, 2 * input_dim), lambda i: (i, 0)))

    flops = 2 * Bp * sum(w.shape[0] * w.shape[1] for w in flat[0::2])
    bytes_accessed = (Bp * (2 * input_dim + encoding_dim + 2 * input_dim) * 4
                      + sum(int(p.size) * p.dtype.itemsize for p in flat))

    enc, dec = pl.pallas_call(
        _autoencoder_kernel,
        out_shape=(jax.ShapeDtypeStruct((Bp, encoding_dim), jnp.float32),
                   jax.ShapeDtypeStruct((Bp, 2 * input_dim), jnp.float32)),
        grid_spec=pltpu.PrefetchScalarGridSpec(
            num_scalar_prefetch=0,
            grid=(Bp // tb,),
            in_specs=in_specs,
            out_specs=out_specs),
        compiler_params=pltpu.CompilerParams(
            dimension_semantics=("parallel",)),
        cost_estimate=pl.CostEstimate(flops=flops, transcendentals=0,
                                      bytes_accessed=bytes_accessed),
    )(x2, *flat)

    enc = enc[:B]
    dec = dec[:B].reshape(-1, 2, input_dim)   # decoded.reshape(-1, 2, 128)
    return enc, dec


def _reference_forward(x, params, input_dim=INPUT_DIM):
    """Pure-JAX reference matching the PyTorch semantics."""
    def clin(h, wr, wi, br, bi):
        n = wr.shape[0]
        hr, hi = h[:, :n], h[:, n:]
        out_r = hr @ wr + br - (hi @ wi + bi)
        out_i = hi @ wr + br + (hr @ wi + bi)
        return jnp.concatenate([out_r, out_i], axis=-1)

    x2 = x.reshape(-1, 2 * input_dim).astype(jnp.float32)
    h = jax.nn.relu(clin(x2, *params[0]))
    enc = clin(h, *params[1])
    d = jax.nn.relu(clin(enc, *params[2]))
    dec = clin(d, *params[3])
    return enc, dec.reshape(-1, 2, input_dim)


if __name__ == "__main__":
    key = jax.random.PRNGKey(0)
    kp, kx1, kx2 = jax.random.split(key, 3)
    params = init_params(kp)

    # small input: batch=2, "complex" channel dim=2, features=128 -> reshapes to [2, 256]
    x = jax.random.normal(kx1, (2, 2, 128), dtype=jnp.float32)
    enc, dec = complex_autoencoder(x, params)
    jax.block_until_ready((enc, dec))

    enc_ref, dec_ref = _reference_forward(x, params)
    assert enc.shape == (2, ENCODING_DIM), enc.shape
    assert dec.shape == (2, 2, 128), dec.shape
    assert jnp.allclose(enc, enc_ref, atol=1e-4, rtol=1e-4)
    assert jnp.allclose(dec, dec_ref, atol=1e-4, rtol=1e-4)

    # multi-step grid + padding path: B=20 with block_b=8 -> grid=(3,), pad to 24
    xb = jax.random.normal(kx2, (20, 2, 128), dtype=jnp.float32)
    enc_b, dec_b = complex_autoencoder(xb, params, block_b=8)
    jax.block_until_ready((enc_b, dec_b))
    enc_bref, dec_bref = _reference_forward(xb, params)
    assert enc_b.shape == (20, ENCODING_DIM)
    assert dec_b.shape == (20, 2, 128)
    assert jnp.allclose(enc_b, enc_bref, atol=1e-4, rtol=1e-4)
    assert jnp.allclose(dec_b, dec_bref, atol=1e-4, rtol=1e-4)

    # bf16 matmul-operand path (bf16-native MXUs on v6e/v7x); f32 accumulation,
    # validated at a looser tolerance as recommended.
    enc16, dec16 = complex_autoencoder(x, params, use_bf16=True)
    jax.block_until_ready((enc16, dec16))
    assert jnp.allclose(enc16, enc_ref, atol=1e-1, rtol=1e-1)
    assert jnp.allclose(dec16, dec_ref, atol=1e-1, rtol=1e-1)

    print("KERNEL_OK")
</pallas_src>

<mosaic_0001>
module attributes {stable_mosaic.version = 11 : i64} {
  func.func @_autoencoder_kernel(%arg0: i32, %arg1: memref<8x256xf32, #tpu.memory_space<vmem>>, %arg2: memref<256x128xf32, #tpu.memory_space<vmem>>, %arg3: memref<1x128xf32, #tpu.memory_space<vmem>>, %arg4: memref<128x64xf32, #tpu.memory_space<vmem>>, %arg5: memref<1x64xf32, #tpu.memory_space<vmem>>, %arg6: memref<64x128xf32, #tpu.memory_space<vmem>>, %arg7: memref<1x128xf32, #tpu.memory_space<vmem>>, %arg8: memref<128x256xf32, #tpu.memory_space<vmem>>, %arg9: memref<1x256xf32, #tpu.memory_space<vmem>>, %arg10: memref<8x64xf32, #tpu.memory_space<vmem>>, %arg11: memref<8x256xf32, #tpu.memory_space<vmem>>) attributes {dimension_semantics = [#tpu.dimension_semantics<parallel>], iteration_bounds = array<i64: 1>, scalar_prefetch = 0 : i64, scratch_operands = 0 : i64, tpu.core_type = #tpu.core_type<tc>, window_params = [{transform_indices = @transform_0, window_bounds = array<i64: 8, 256>}, {pipeline_mode = #tpu.pipeline_mode<synchronous>, transform_indices = @transform_1, window_bounds = array<i64: 256, 128>}, {pipeline_mode = #tpu.pipeline_mode<synchronous>, transform_indices = @transform_2, window_bounds = array<i64: 1, 128>}, {pipeline_mode = #tpu.pipeline_mode<synchronous>, transform_indices = @transform_3, window_bounds = array<i64: 128, 64>}, {pipeline_mode = #tpu.pipeline_mode<synchronous>, transform_indices = @transform_4, window_bounds = array<i64: 1, 64>}, {pipeline_mode = #tpu.pipeline_mode<synchronous>, transform_indices = @transform_5, window_bounds = array<i64: 64, 128>}, {pipeline_mode = #tpu.pipeline_mode<synchronous>, transform_indices = @transform_6, window_bounds = array<i64: 1, 128>}, {pipeline_mode = #tpu.pipeline_mode<synchronous>, transform_indices = @transform_7, window_bounds = array<i64: 128, 256>}, {pipeline_mode = #tpu.pipeline_mode<synchronous>, transform_indices = @transform_8, window_bounds = array<i64: 1, 256>}, {transform_indices = @transform_9, window_bounds = array<i64: 8, 64>}, {transform_indices = @transform_10, window_bounds = array<i64: 8, 256>}]} {
    %c0 = arith.constant 0 : index
    %c0_0 = arith.constant 0 : index
    %0 = vector.load %arg1[%c0, %c0_0] : memref<8x256xf32, #tpu.memory_space<vmem>>, vector<8x256xf32>
    %c0_1 = arith.constant 0 : index
    %c0_2 = arith.constant 0 : index
    %1 = vector.load %arg2[%c0_1, %c0_2] : memref<256x128xf32, #tpu.memory_space<vmem>>, vector<256x128xf32>
    %cst = arith.constant dense<0.000000e+00> : vector<8x128xf32>
    %2 = tpu.matmul %0, %1, %cst {dimension_numbers = #tpu.dot_dimension_numbers<[1], [0], [0], [1], [0, 0, 1, 1], [], []>} : vector<8x256xf32>, vector<256x128xf32>, vector<8x128xf32> -> vector<8x128xf32>
    %c0_3 = arith.constant 0 : index
    %c0_4 = arith.constant 0 : index
    %3 = vector.load %arg3[%c0_3, %c0_4] : memref<1x128xf32, #tpu.memory_space<vmem>>, vector<1x128xf32>
    %4 = vector.broadcast %3 : vector<1x128xf32> to vector<8x128xf32>
    %5 = arith.addf %2, %4 : vector<8x128xf32>
    %cst_5 = arith.constant 0.000000e+00 : f32
    %6 = vector.broadcast %cst_5 : f32 to vector<8x128xf32>
    %7 = arith.maximumf %5, %6 : vector<8x128xf32>
    %c0_6 = arith.constant 0 : index
    %c0_7 = arith.constant 0 : index
    %8 = vector.load %arg4[%c0_6, %c0_7] : memref<128x64xf32, #tpu.memory_space<vmem>>, vector<128x64xf32>
    %cst_8 = arith.constant dense<0.000000e+00> : vector<8x64xf32>
    %9 = tpu.matmul %7, %8, %cst_8 {dimension_numbers = #tpu.dot_dimension_numbers<[1], [0], [0], [1], [0, 0, 1, 1], [], []>} : vector<8x128xf32>, vector<128x64xf32>, vector<8x64xf32> -> vector<8x64xf32>
    %c0_9 = arith.constant 0 : index
    %c0_10 = arith.constant 0 : index
    %10 = vector.load %arg5[%c0_9, %c0_10] : memref<1x64xf32, #tpu.memory_space<vmem>>, vector<1x64xf32>
    %11 = vector.broadcast %10 : vector<1x64xf32> to vector<8x64xf32>
    %12 = arith.addf %9, %11 : vector<8x64xf32>
    %c0_11 = arith.constant 0 : index
    %c0_12 = arith.constant 0 : index
    %13 = vector.load %arg10[%c0_11, %c0_12] : memref<8x64xf32, #tpu.memory_space<vmem>>, vector<8x64xf32>
    tpu.vector_store %arg10[%c0_11, %c0_12], %12 {strides = array<i32>} : memref<8x64xf32, #tpu.memory_space<vmem>>, vector<8x64xf32>,
    %c0_13 = arith.constant 0 : index
    %c0_14 = arith.constant 0 : index
    %14 = vector.load %arg6[%c0_13, %c0_14] : memref<64x128xf32, #tpu.memory_space<vmem>>, vector<64x128xf32>
    %cst_15 = arith.constant dense<0.000000e+00> : vector<8x128xf32>
    %15 = tpu.matmul %12, %14, %cst_15 {dimension_numbers = #tpu.dot_dimension_numbers<[1], [0], [0], [1], [0, 0, 1, 1], [], []>} : vector<8x64xf32>, vector<64x128xf32>, vector<8x128xf32> -> vector<8x128xf32>
    %c0_16 = arith.constant 0 : index
    %c0_17 = arith.constant 0 : index
    %16 = vector.load %arg7[%c0_16, %c0_17] : memref<1x128xf32, #tpu.memory_space<vmem>>, vector<1x128xf32>
    %17 = vector.broadcast %16 : vector<1x128xf32> to vector<8x128xf32>
    %18 = arith.addf %15, %17 : vector<8x128xf32>
    %cst_18 = arith.constant 0.000000e+00 : f32
    %19 = vector.broadcast %cst_18 : f32 to vector<8x128xf32>
    %20 = arith.maximumf %18, %19 : vector<8x128xf32>
    %c0_19 = arith.constant 0 : index
    %c0_20 = arith.constant 0 : index
    %21 = vector.load %arg8[%c0_19, %c0_20] : memref<128x256xf32, #tpu.memory_space<vmem>>, vector<128x256xf32>
    %cst_21 = arith.constant dense<0.000000e+00> : vector<8x256xf32>
    %22 = tpu.matmul %20, %21, %cst_21 {dimension_numbers = #tpu.dot_dimension_numbers<[1], [0], [0], [1], [0, 0, 1, 1], [], []>} : vector<8x128xf32>, vector<128x256xf32>, vector<8x256xf32> -> vector<8x256xf32>
    %c0_22 = arith.constant 0 : index
    %c0_23 = arith.constant 0 : index
    %23 = vector.load %arg9[%c0_22, %c0_23] : memref<1x256xf32, #tpu.memory_space<vmem>>, vector<1x256xf32>
    %24 = vector.broadcast %23 : vector<1x256xf32> to vector<8x256xf32>
    %25 = arith.addf %22, %24 : vector<8x256xf32>
    %c0_24 = arith.constant 0 : index
    %c0_25 = arith.constant 0 : index
    %26 = vector.load %arg11[%c0_24, %c0_25] : memref<8x256xf32, #tpu.memory_space<vmem>>, vector<8x256xf32>
    tpu.vector_store %arg11[%c0_24, %c0_25], %25 {strides = array<i32>} : memref<8x256xf32, #tpu.memory_space<vmem>>, vector<8x256xf32>,
    return
  }
  func.func @transform_0(%arg0: i32) -> (i32, i32) {
    %c0_i32 = arith.constant 0 : i32
    %c0_i32_0 = arith.constant 0 : i32
    return %arg0, %c0_i32 : i32, i32
  }
  func.func @transform_1(%arg0: i32) -> (i32, i32) {
    %c0_i32 = arith.constant 0 : i32
    %c0_i32_0 = arith.constant 0 : i32
    %c0_i32_1 = arith.constant 0 : i32
    return %c0_i32, %c0_i32_0 : i32, i32
  }
  func.func @transform_2(%arg0: i32) -> (i32, i32) {
    %c0_i32 = arith.constant 0 : i32
    %c0_i32_0 = arith.constant 0 : i32
    %c0_i32_1 = arith.constant 0 : i32
    return %c0_i32, %c0_i32_0 : i32, i32
  }
  func.func @transform_3(%arg0: i32) -> (i32, i32) {
    %c0_i32 = arith.constant 0 : i32
    %c0_i32_0 = arith.constant 0 : i32
    %c0_i32_1 = arith.constant 0 : i32
    return %c0_i32, %c0_i32_0 : i32, i32
  }
  func.func @transform_4(%arg0: i32) -> (i32, i32) {
    %c0_i32 = arith.constant 0 : i32
    %c0_i32_0 = arith.constant 0 : i32
    %c0_i32_1 = arith.constant 0 : i32
    return %c0_i32, %c0_i32_0 : i32, i32
  }
  func.func @transform_5(%arg0: i32) -> (i32, i32) {
    %c0_i32 = arith.constant 0 : i32
    %c0_i32_0 = arith.constant 0 : i32
    %c0_i32_1 = arith.constant 0 : i32
    return %c0_i32, %c0_i32_0 : i32, i32
  }
  func.func @transform_6(%arg0: i32) -> (i32, i32) {
    %c0_i32 = arith.constant 0 : i32
    %c0_i32_0 = arith.constant 0 : i32
    %c0_i32_1 = arith.constant 0 : i32
    return %c0_i32, %c0_i32_0 : i32, i32
  }
  func.func @transform_7(%arg0: i32) -> (i32, i32) {
    %c0_i32 = arith.constant 0 : i32
    %c0_i32_0 = arith.constant 0 : i32
    %c0_i32_1 = arith.constant 0 : i32
    return %c0_i32, %c0_i32_0 : i32, i32
  }
  func.func @transform_8(%arg0: i32) -> (i32, i32) {
    %c0_i32 = arith.constant 0 : i32
    %c0_i32_0 = arith.constant 0 : i32
    %c0_i32_1 = arith.constant 0 : i32
    return %c0_i32, %c0_i32_0 : i32, i32
  }
  func.func @transform_9(%arg0: i32) -> (i32, i32) {
    %c0_i32 = arith.constant 0 : i32
    %c0_i32_0 = arith.constant 0 : i32
    return %arg0, %c0_i32 : i32, i32
  }
  func.func @transform_10(%arg0: i32) -> (i32, i32) {
    %c0_i32 = arith.constant 0 : i32
    %c0_i32_0 = arith.constant 0 : i32
    return %arg0, %c0_i32 : i32, i32
  }
}

</mosaic_0001>

<bundles_post_ra>
// kernel: tpu_custom_call.1
= control target key start
LH: loop header
LB: loop body
LE: loop exit
PB: predicated region body
PF: predicated region fallthrough
CT: control target
= control target key end

     0   :  { %16 = vsyncpa [#allocation3], 0  ;;  %s918_s0 = inlined_call_operand.vmem [shape: f32[8,256], index: 0, kind: input, shape index: {}]   ;;  %s919_s1 = inlined_call_operand.hbm [shape: f32[256,128], index: 1, kind: input, shape index: {}]   ;;  %s920_s2 = inlined_call_operand.vmem [shape: f32[1,128], index: 2, kind: input, shape index: {}]   ;;  %s921_s3 = inlined_call_operand.vmem [shape: f32[128,64], index: 3, kind: input, shape index: {}]   ;;  %s922_s4 = inlined_call_operand.vmem [shape: f32[1,64], index: 4, kind: input, shape index: {}]   ;;  %s923_s5 = inlined_call_operand.vmem [shape: f32[64,128], index: 5, kind: input, shape index: {}]   ;;  %s924_s6 = inlined_call_operand.vmem [shape: f32[1,128], index: 6, kind: input, shape index: {}]   ;;  %s925_s7 = inlined_call_operand.hbm [shape: f32[128,256], index: 7, kind: input, shape index: {}]   ;;  %s926_s8 = inlined_call_operand.vmem [shape: f32[1,256], index: 8, kind: input, shape index: {}]   ;;  %s927_s9 = inlined_call_operand.hbm [shape: f32[8,64], index: 9, kind: output, shape index: {0}]   ;;  %s928_s10 = inlined_call_operand.hbm [shape: f32[8,256], index: 10, kind: output, shape index: {1}]  }
   0x1   :  { %17 = vsyncpa [#allocation6], 0 }
   0x2   :  { %18 = vsyncpa [#allocation4], 0 }
   0x3   :  { %19 = vsyncpa [#allocation9], 0  ;;  %s724_s13 = smov [#allocation2]  }
   0x4   :  { %s27_s14 = sshll.u32 %s724_s13, 4  ;;  %s28_s14 = int_to_ptr.vmem [resolvable:$true] %s27_s14 }
   0x5   :  { %s644_s15 = scalar_lea.vmem %s28_s14, 4096  ;;  %p649_p1 = scmp.lt.s32.totalorder %s28_s14, %s28_s14 }
   0x6   :  { %p645_p0 = scmp.ne.s32.totalorder %s28_s14, %s644_s15  ;;  %p650_p2 = scmp.lt.s32.totalorder %s644_s15, %s644_s15 }
   0x8   :  { %p651_p3 = por %p650_p2, %p649_p1 }
   0xa   :  { %p652_p4 = pnand %p651_p3, %p645_p0 }
   0xc   :  { %655 = shalt.err (!%p652_p4)
}
   0xd   :  { %s725_s16 = smov 128   ;;  %s726_s17 = smov 8  }
   0xe   :  { %33 = dma.hbm_to_vmem [thread:$0]  %s919_s1, 4096, %s28_s14, [#allocation3], %s725_s16, %s725_s16, %s726_s17  }
   0xf   :  { %s727_s20 = smov [#allocation5]  }
  0x10   :  { %s49_s21 = sshll.u32 %s727_s20, 4  ;;  %s50_s21 = int_to_ptr.vmem [resolvable:$true] %s49_s21 }
  0x11   :  { %s664_s22 = scalar_lea.vmem %s50_s21, 4096  ;;  %p669_p6 = scmp.lt.s32.totalorder %s50_s21, %s50_s21 }
  0x12   :  { %p665_p5 = scmp.ne.s32.totalorder %s50_s21, %s664_s22  ;;  %p670_p7 = scmp.lt.s32.totalorder %s664_s22, %s664_s22 }
  0x14   :  { %p671_p8 = por %p670_p7, %p669_p6 }
  0x16   :  { %p672_p9 = pnand %p671_p8, %p665_p5 }
  0x18   :  { %675 = shalt.err (!%p672_p9)
}
  0x19   :  { %s728_s23 = smov 256   ;;  %s729_s24 = smov 16  }
  0x1a   :  { %55 = dma.hbm_to_vmem [thread:$0]  %s925_s7, 4096, %s50_s21, [#allocation6], %s728_s23, %s728_s23, %s729_s24  }
  0x1b   :  { %716 = dma.done.wait [#allocation3], 4096  }
  0x1c   :  { %717 = vsyncadd [#allocation3], 4294963200 }
  0x1d   :  { %718 = dma.done.wait [#allocation6], 4096  }
  0x1e   :  { %719 = vsyncadd [#allocation6], 4294963200  ;;  %v730_v0 = vmov 0.0   ;;  %v97_v1 = vld [vmem:[#allocation2 + $0xf8] sm:$0xff]  ;;  %v96_v3 = vld [vmem:[#allocation2 + $0xf0] sm:$0xff]  ;;  %vm731_vm0 = vmmov 0  }
  0x1f   :  { %572 = vmatprep.subr.mxu1 %v730_v0  ;;  %v81_v2 = vld [vmem:[#allocation2 + $0x78] sm:$0xff]  ;;  %511 = vmatprep.subr.mxu0 %v97_v1  ;;  %v80_v4 = vld [vmem:[#allocation2 + $0x70] sm:$0xff]  ;;  %v95_v5 = vld [vmem:[#allocation2 + $0xe8] sm:$0xff]  ;;  %vm269_vm1 = vcmask 523264  }
  0x20   :  { %512 = vmatpush3.msra.mxu0 %v81_v2  ;;  %v79_v6 = vld [vmem:[#allocation2 + $0x68] sm:$0xff]  ;;  %v94_v7 = vld [vmem:[#allocation2 + $0xe0] sm:$0xff]  ;;  %v93_v9 = vld [vmem:[#allocation2 + $0xd8] sm:$0xff]  ;;  %604 = vmatprep.mubr.msk.f32.mxu1 %vm731_vm0, %v730_v0 }
  0x21   :  { %513 = vmatprep.subr.mxu0 %v96_v3  ;;  %v78_v8 = vld [vmem:[#allocation2 + $0x60] sm:$0xff]  ;;  %v77_v10 = vld [vmem:[#allocation2 + $0x58] sm:$0xff]  ;;  %v92_v11 = vld [vmem:[#allocation2 + $0xd0] sm:$0xff] }
  0x22   :  { %514 = vmatpush3.msra.mxu0 %v80_v4  ;;  %v76_v12 = vld [vmem:[#allocation2 + $0x50] sm:$0xff]  ;;  %v91_v13 = vld [vmem:[#allocation2 + $0xc8] sm:$0xff]  ;;  %v191_v16 = vld [vmem:[%s921_s3 + $0x78] sm:$0xff] }
  0x23   :  { %515 = vmatprep.subr.mxu0 %v95_v5  ;;  %v65_v14 = vld [vmem:[%s918_s0 + $0x8] sm:$0xff]  ;;  %v190_v17 = vld [vmem:[%s921_s3 + $0x70] sm:$0xff]  ;;  %v90_v18 = vld [vmem:[#allocation2 + $0xc0] sm:$0xff]  ;;  %573 = vmatpush3.msra.mxu1 %v191_v16 }
  0x24   :  { %516 = vmatpush3.msra.mxu0 %v79_v6  ;;  %v75_v15 = vld [vmem:[#allocation2 + $0x48] sm:$0xff]  ;;  %169 = vmatprep.mubr.f32.mxu0 %v65_v14  ;;  %v74_v19 = vld [vmem:[#allocation2 + $0x40] sm:$0xff]  ;;  %v89_v21 = vld [vmem:[#allocation2 + $0xb8] sm:$0xff] }
  0x25   :  { %517 = vmatprep.subr.mxu0 %v94_v7  ;;  %574 = vmatprep.subr.mxu1 %v730_v0  ;;  %v189_v20 = vld [vmem:[%s921_s3 + $0x68] sm:$0xff]  ;;  %v73_v22 = vld [vmem:[#allocation2 + $0x38] sm:$0xff]  ;;  %v188_v23 = vld [vmem:[%s921_s3 + $0x60] sm:$0xff] }
  0x26   :  { %518 = vmatpush3.msra.mxu0 %v78_v8  ;;  %575 = vmatpush3.msra.mxu1 %v190_v17  ;;  %v88_v24 = vld [vmem:[#allocation2 + $0xb0] sm:$0xff]  ;;  %v187_v26 = vld [vmem:[%s921_s3 + $0x58] sm:$0xff]  ;;  %v87_v27 = vld [vmem:[#allocation2 + $0xa8] sm:$0xff] }
  0x27   :  { %519 = vmatprep.subr.mxu0 %v93_v9  ;;  %576 = vmatprep.subr.mxu1 %v730_v0  ;;  %v72_v25 = vld [vmem:[#allocation2 + $0x30] sm:$0xff]  ;;  %v71_v28 = vld [vmem:[#allocation2 + $0x28] sm:$0xff]  ;;  %v86_v30 = vld [vmem:[#allocation2 + $0xa0] sm:$0xff] }
  0x28   :  { %520 = vmatpush3.msra.mxu0 %v77_v10  ;;  %577 = vmatpush3.msra.mxu1 %v189_v20  ;;  %v186_v29 = vld [vmem:[%s921_s3 + $0x50] sm:$0xff]  ;;  %v70_v31 = vld [vmem:[#allocation2 + $0x20] sm:$0xff]  ;;  %v185_v32 = vld [vmem:[%s921_s3 + $0x48] sm:$0xff] }
  0x29   :  { %521 = vmatprep.subr.mxu0 %v92_v11  ;;  %578 = vmatprep.subr.mxu1 %v730_v0  ;;  %v85_v33 = vld [vmem:[#allocation2 + $0x98] sm:$0xff]  ;;  %v184_v35 = vld [vmem:[%s921_s3 + $0x40] sm:$0xff]  ;;  %v84_v36 = vld [vmem:[#allocation2 + $0x90] sm:$0xff] }
  0x2a   :  { %522 = vmatpush3.msra.mxu0 %v76_v12  ;;  %579 = vmatpush3.msra.mxu1 %v188_v23  ;;  %v69_v34 = vld [vmem:[#allocation2 + $0x18] sm:$0xff]  ;;  %v68_v37 = vld [vmem:[#allocation2 + $0x10] sm:$0xff]  ;;  %v83_v39 = vld [vmem:[#allocation2 + $0x88] sm:$0xff] }
  0x2b   :  { %523 = vmatprep.subr.mxu0 %v91_v13  ;;  %580 = vmatprep.subr.mxu1 %v730_v0  ;;  %v183_v38 = vld [vmem:[%s921_s3 + $0x38] sm:$0xff]  ;;  %v67_v40 = vld [vmem:[#allocation2 + $0x8] sm:$0xff]  ;;  %v182_v41 = vld [vmem:[%s921_s3 + $0x30] sm:$0xff] }
  0x2c   :  { %524 = vmatpush3.msra.mxu0 %v75_v15  ;;  %581 = vmatpush3.msra.mxu1 %v187_v26  ;;  %v82_v42 = vld [vmem:[#allocation2 + $0x80] sm:$0xff]  ;;  %v181_v44 = vld [vmem:[%s921_s3 + $0x28] sm:$0xff]  ;;  %v179_v47 = vld [vmem:[%s921_s3 + $0x18] sm:$0xff] }
  0x2d   :  { %525 = vmatprep.subr.mxu0 %v90_v18  ;;  %582 = vmatprep.subr.mxu1 %v730_v0  ;;  %v66_v43 = vld [vmem:[#allocation2] sm:$0xff]  ;;  %v178_v48 = vld [vmem:[%s921_s3 + $0x10] sm:$0xff]  ;;  %v177_v49 = vld [vmem:[%s921_s3 + $0x8] sm:$0xff] }
  0x2e   :  { %526 = vmatpush3.msra.mxu0 %v74_v19  ;;  %583 = vmatpush3.msra.mxu1 %v186_v29  ;;  %v64_v45 = vld [vmem:[%s918_s0] sm:$0xff]  ;;  %v278_v51 = vld [vmem:[%s923_s5 + $0x38] sm:$0xff]  ;;  %v277_v52 = vld [vmem:[%s923_s5 + $0x30] sm:$0xff] }
  0x2f   :  { %527 = vmatprep.subr.mxu0 %v89_v21  ;;  %584 = vmatprep.subr.mxu1 %v730_v0  ;;  %v180_v46 = vld [vmem:[%s921_s3 + $0x20] sm:$0xff]  ;;  %v276_v53 = vld [vmem:[%s923_s5 + $0x28] sm:$0xff]  ;;  %v274_v55 = vld [vmem:[%s923_s5 + $0x18] sm:$0xff] }
  0x30   :  { %528 = vmatpush3.msra.mxu0 %v73_v22  ;;  %585 = vmatpush3.msra.mxu1 %v185_v32  ;;  %v176_v50 = vld [vmem:[%s921_s3] sm:$0xff]  ;;  %v273_v56 = vld [vmem:[%s923_s5 + $0x10] sm:$0xff]  ;;  %v272_v63 = vld [vmem:[%s923_s5 + $0x8] sm:$0xff] }
  0x31   :  { %529 = vmatprep.subr.mxu0 %v88_v24  ;;  %586 = vmatprep.subr.mxu1 %v730_v0  ;;  %v275_v54 = vld [vmem:[%s923_s5 + $0x20] sm:$0xff]  ;;  %v391_v2 = vld [vmem:[#allocation5 + $0xf8] sm:$0xff]  ;;  %v390_v3 = vld [vmem:[#allocation5 + $0xf0] sm:$0xff] }
  0x32   :  { %530 = vmatpush3.msra.mxu0 %v72_v25  ;;  %587 = vmatpush3.msra.mxu1 %v184_v35  ;;  %v507_v58 = vld [vmem:[%s920_s2] ss:$0 sm:$0xff]  ;;  %v389_v4 = vld [vmem:[#allocation5 + $0xe8] sm:$0xff]  ;;  %v387_v6 = vld [vmem:[#allocation5 + $0xd8] sm:$0xff] }
  0x33   :  { %531 = vmatprep.subr.mxu0 %v87_v27  ;;  %588 = vmatprep.subr.mxu1 %v730_v0  ;;  %v271_v1 = vld [vmem:[%s923_s5] sm:$0xff]  ;;  %v386_v7 = vld [vmem:[#allocation5 + $0xd0] sm:$0xff]  ;;  %v385_v8 = vld [vmem:[#allocation5 + $0xc8] sm:$0xff] }
  0x34   :  { %532 = vmatpush3.msra.mxu0 %v71_v28  ;;  %589 = vmatpush3.msra.mxu1 %v183_v38  ;;  %v388_v5 = vld [vmem:[#allocation5 + $0xe0] sm:$0xff]  ;;  %v382_v10 = vld [vmem:[#allocation5 + $0xb0] sm:$0xff]  ;;  %v381_v11 = vld [vmem:[#allocation5 + $0xa8] sm:$0xff] }
  0x35   :  { %533 = vmatprep.subr.mxu0 %v86_v30  ;;  %590 = vmatprep.subr.mxu1 %v730_v0  ;;  %v384_v9 = vld [vmem:[#allocation5 + $0xc0] sm:$0xff]  ;;  %v379_v13 = vld [vmem:[#allocation5 + $0x98] sm:$0xff]  ;;  %v378_v14 = vld [vmem:[#allocation5 + $0x90] sm:$0xff] }
  0x36   :  { %534 = vmatpush3.msra.mxu0 %v70_v31  ;;  %591 = vmatpush3.msra.mxu1 %v182_v41  ;;  %v380_v12 = vld [vmem:[#allocation5 + $0xa0] sm:$0xff]  ;;  %v377_v15 = vld [vmem:[#allocation5 + $0x88] sm:$0xff]  ;;  %v375_v17 = vld [vmem:[#allocation5 + $0x78] sm:$0xff] }
  0x37   :  { %535 = vmatprep.subr.mxu0 %v85_v33  ;;  %592 = vmatprep.subr.mxu1 %v730_v0  ;;  %v376_v16 = vld [vmem:[#allocation5 + $0x80] sm:$0xff]  ;;  %v374_v18 = vld [vmem:[#allocation5 + $0x70] sm:$0xff]  ;;  %v373_v19 = vld [vmem:[#allocation5 + $0x68] sm:$0xff] }
  0x38   :  { %536 = vmatpush3.msra.mxu0 %v69_v34  ;;  %593 = vmatpush3.msra.mxu1 %v181_v44  ;;  %v372_v20 = vld [vmem:[#allocation5 + $0x60] sm:$0xff]  ;;  %v371_v21 = vld [vmem:[#allocation5 + $0x58] sm:$0xff]  ;;  %v370_v22 = vld [vmem:[#allocation5 + $0x50] sm:$0xff] }
  0x39   :  { %537 = vmatprep.subr.mxu0 %v84_v36  ;;  %594 = vmatprep.subr.mxu1 %v730_v0  ;;  %v369_v23 = vld [vmem:[#allocation5 + $0x48] sm:$0xff]  ;;  %v368_v24 = vld [vmem:[#allocation5 + $0x40] sm:$0xff]  ;;  %v367_v25 = vld [vmem:[#allocation5 + $0x38] sm:$0xff] }
  0x3a   :  { %538 = vmatpush3.msra.mxu0 %v68_v37  ;;  %595 = vmatpush3.msra.mxu1 %v180_v46  ;;  %v366_v26 = vld [vmem:[#allocation5 + $0x30] sm:$0xff]  ;;  %v365_v27 = vld [vmem:[#allocation5 + $0x28] sm:$0xff]  ;;  %v508_v28 = vld [vmem:[%s922_s4] ss:$0 sm:$0xff]  ;;  %s732_s4 = smov [#allocation7]  }
  0x3b   :  { %539 = vmatprep.subr.mxu0 %v83_v39  ;;  %596 = vmatprep.subr.mxu1 %v730_v0  ;;  %v364_v32 = vld [vmem:[#allocation5 + $0x20] sm:$0xff]  ;;  %v363_v33 = vld [vmem:[#allocation5 + $0x18] sm:$0xff]  ;;  %v362_v34 = vld [vmem:[#allocation5 + $0x10] sm:$0xff]  ;;  %s483_s14 = sshll.u32 %s732_s4, 4  ;;  %s484_s14 = int_to_ptr.vmem [resolvable:$true] %s483_s14 }
  0x3c   :  { %540 = vmatpush3.msra.mxu0 %v67_v40  ;;  %597 = vmatpush3.msra.mxu1 %v179_v47  ;;  %v361_v35 = vld [vmem:[#allocation5 + $0x8] sm:$0xff]  ;;  %v360_v36 = vld [vmem:[#allocation5] sm:$0xff]  ;;  %s676_s15 = scalar_lea.vmem %s484_s14, 128  ;;  %p681_p11 = scmp.lt.s32.totalorder %s484_s14, %s484_s14 }
  0x3d   :  { %541 = vmatprep.subr.mxu0 %v82_v42  ;;  %598 = vmatprep.subr.mxu1 %v730_v0  ;;  %v509_v37 = vld [vmem:[%s924_s6] ss:$0 sm:$0xff]  ;;  %p677_p10 = scmp.ne.s32.totalorder %s484_s14, %s676_s15  ;;  %p682_p12 = scmp.lt.s32.totalorder %s676_s15, %s676_s15 }
  0x3e   :  { %542 = vmatpush3.msra.mxu0 %v66_v43  ;;  %599 = vmatpush3.msra.mxu1 %v178_v48 }
  0x3f   :  { %170 = vmatmul.mubr.f32.vlgmr.msra.gmra.mxu0 %v64_v45  ;;  %607 = vmatprep.subr.mxu0 %v730_v0  ;;  %p683_p13 = por %p682_p12, %p681_p11 }
  0x40   :  { %600 = vmatprep.subr.mxu1 %v730_v0  ;;  %623 = vmatprep.mubr.msk.f32.mxu0 %vm731_vm0, %v730_v0 }
  0x41   :  { %601 = vmatpush3.msra.mxu1 %v177_v49  ;;  %608 = vmatpush3.msra.mxu0 %v278_v51  ;;  %p684_p0 = pnand %p683_p13, %p677_p10 }
  0x42   :  { %602 = vmatprep.subr.mxu1 %v730_v0  ;;  %609 = vmatprep.subr.mxu0 %v730_v0 }
  0x43   :  { %603 = vmatpush3.msra.mxu1 %v176_v50  ;;  %610 = vmatpush3.msra.mxu0 %v277_v52 }
  0x44   :  { %611 = vmatprep.subr.mxu0 %v730_v0  ;;  %404 = vmatprep.subr.mxu1 %v391_v2 }
  0x45   :  { %612 = vmatpush3.msra.mxu0 %v276_v53 }
  0x46   :  { %613 = vmatprep.subr.mxu0 %v730_v0 }
  0x47   :  { %614 = vmatpush3.msra.mxu0 %v275_v54 }
  0x48   :  { %615 = vmatprep.subr.mxu0 %v730_v0 }
  0x49   :  { %616 = vmatpush3.msra.mxu0 %v274_v55 }
  0x4a   :  { %617 = vmatprep.subr.mxu0 %v730_v0 }
  0x4b   :  { %618 = vmatpush3.msra.mxu0 %v273_v56 }
  0x4c   :  { %619 = vmatprep.subr.mxu0 %v730_v0 }
  0x4d   :  { %620 = vmatpush3.msra.mxu0 %v272_v63 }
  0x4e   :  { %621 = vmatprep.subr.mxu0 %v730_v0 }
  0x4f   :  { %622 = vmatpush3.msra.mxu0 %v271_v1 }
  0xff   :  { %v543_v57 = vpop.f32.mrf.mxu0 }
 0x101   :  { %v544_v59 = vpop.f32.mrf.mxu0 }
 0x102   :  { %v545_v60 = vadd.f32 %v544_v59, %v543_v57 }
 0x104   :  { %v172_v61 = vadd.f32 %v545_v60, %v507_v58 }
 0x106   :  { %v175_v62 = vmax.f32 %v172_v61, 0.0 }
 0x108   :  { %605 = vmatmul.mubr.f32.vlgmr.msra.gmra.mxu1 %v175_v62 }
 0x109   :  { %468 = vmatprep.mubr.f32.mxu1 %v730_v0  ;;  %405 = vmatpush1.msra.mxu1 %v390_v3  ;;  %v383_v0 = vld [vmem:[#allocation5 + $0xb8] sm:$0xff] }
 0x10a   :  { %406 = vmatprep.subr.mxu1 %v389_v4 }
 0x10b   :  { %407 = vmatpush1.msra.mxu1 %v388_v5 }
 0x10c   :  { %408 = vmatprep.subr.mxu1 %v387_v6 }
 0x10d   :  { %409 = vmatpush1.msra.mxu1 %v386_v7 }
 0x10e   :  { %410 = vmatprep.subr.mxu1 %v385_v8 }
 0x10f   :  { %411 = vmatpush1.msra.mxu1 %v384_v9 }
 0x110   :  { %412 = vmatprep.subr.mxu1 %v383_v0 }
 0x111   :  { %413 = vmatpush1.msra.mxu1 %v382_v10 }
 0x112   :  { %414 = vmatprep.subr.mxu1 %v381_v11 }
 0x113   :  { %415 = vmatpush1.msra.mxu1 %v380_v12 }
 0x114   :  { %416 = vmatprep.subr.mxu1 %v379_v13 }
 0x115   :  { %417 = vmatpush1.msra.mxu1 %v378_v14 }
 0x116   :  { %418 = vmatprep.subr.mxu1 %v377_v15 }
 0x117   :  { %419 = vmatpush1.msra.mxu1 %v376_v16 }
 0x118   :  { %420 = vmatprep.subr.mxu1 %v375_v17 }
 0x119   :  { %421 = vmatpush1.msra.mxu1 %v374_v18 }
 0x11a   :  { %422 = vmatprep.subr.mxu1 %v373_v19 }
 0x11b   :  { %423 = vmatpush1.msra.mxu1 %v372_v20 }
 0x11c   :  { %424 = vmatprep.subr.mxu1 %v371_v21 }
 0x11d   :  { %425 = vmatpush1.msra.mxu1 %v370_v22 }
 0x11e   :  { %426 = vmatprep.subr.mxu1 %v369_v23 }
 0x11f   :  { %427 = vmatpush1.msra.mxu1 %v368_v24 }
 0x120   :  { %428 = vmatprep.subr.mxu1 %v367_v25 }
 0x121   :  { %429 = vmatpush1.msra.mxu1 %v366_v26 }
 0x122   :  { %430 = vmatprep.subr.mxu1 %v365_v27 }
 0x123   :  { %431 = vmatpush1.msra.mxu1 %v364_v32 }
 0x124   :  { %432 = vmatprep.subr.mxu1 %v363_v33 }
 0x125   :  { %433 = vmatpush1.msra.mxu1 %v362_v34 }
 0x126   :  { %434 = vmatprep.subr.mxu1 %v361_v35 }
 0x127   :  { %435 = vmatpush1.msra.mxu1 %v360_v36 }
 0x1c8   :  { %v265_v29 = vpop.f32.mrf.mxu1 }
 0x1c9   :  { %v266_v30 = vadd.f32 %v508_v28, %v265_v29 }
 0x1ca   :  { %v606_v31 = vpop.f32.mrf.mxu1 }
 0x1cb   :  { %624 = vmatmul.mubr.msk.f32.vlgmr.msra.gmra.mxu0 %vm269_vm1, %v266_v30  ;;  %270 = vst.msk [vmem:[#allocation7] sm:$0xff] %vm269_vm1, %v266_v30 }
 0x28b   :  { %v355_v38 = vpop.f32.mrf.mxu0 }
 0x28c   :  { %v356_v39 = vadd.f32 %v509_v37, %v355_v38 }
 0x28d   :  { %v625_v40 = vpop.f32.mrf.mxu0 }
 0x28e   :  { %v359_v41 = vmax.f32 %v356_v39, 0.0 }
 0x290   :  { %469 = vmatmul.mubr.f32.vlgmr.msra.gmra.mxu1 %v359_v41 }
 0x291   :  { %687 = shalt.err (!%p684_p0)
}
 0x292   :  { %486 = dma.vmem_to_hbm [thread:$0]  %s484_s14, 128, %s927_s9, [#allocation4]   ;;  %v394_v42 = vlaneseq  ;;  %v392_v45 = vld [vmem:[%s926_s8] sm:$0x3] }
 0x293   :  { %s733_s19 = smov [#allocation8]  }
 0x294   :  { %v395_v43 = vshrl.u32 %v394_v42, 7  ;;  %s493_s20 = sshll.u32 %s733_s19, 4  ;;  %s494_s20 = int_to_ptr.vmem [resolvable:$true] %s493_s20 }
 0x295   :  { %s696_s9 = scalar_lea.vmem %s494_s20, 256  ;;  %p701_p2 = scmp.lt.s32.totalorder %s494_s20, %s494_s20 }
 0x296   :  { %v396_v44 = vsub.s32 0, %v395_v43  ;;  %v400_v46 = vsub.s32 1, %v395_v43  ;;  %p697_p1 = scmp.ne.s32.totalorder %s494_s20, %s696_s9  ;;  %p702_p3 = scmp.lt.s32.totalorder %s696_s9, %s696_s9 }
 0x298   :  { %v397_v47 = vrot.slane %v392_v45, %v396_v44  ;;  %v401_v48 = vrot.slane %v392_v45, %v400_v46  ;;  %p703_p4 = por %p702_p3, %p701_p2 }
 0x29a   :  { %p704_p5 = pnand %p703_p4, %p697_p1 }
 0x350   :  { %v470_v49 = vpop.f32.mrf.mxu1 }
 0x351   :  { %v471_v50 = vadd.f32 %v470_v49, %v397_v47 }
 0x352   :  { %v472_v51 = vpop.f32.mrf.mxu1 }
 0x353   :  { %475 = vst [vmem:[#allocation8] sm:$0xff] %v471_v50  ;;  %v473_v52 = vadd.f32 %v472_v51, %v401_v48 }
 0x355   :  { %476 = vst [vmem:[#allocation8 + $0x8] sm:$0xff] %v473_v52 }
 0x356   :  { %707 = shalt.err (!%p704_p5)
}
 0x357   :  { %496 = dma.vmem_to_hbm [thread:$0]  %s494_s20, 256, %s928_s10, [#allocation9]  }
 0x358   :  { %720 = dma.done.wait [#allocation4], 128  }
 0x359   :  { %721 = vsyncadd [#allocation4], 4294967168 }
 0x35a   :  { %722 = dma.done.wait [#allocation9], 256  }
 0x35b   :  { %723 = vsyncadd [#allocation9], 4294967040 }
 0x35c   :  { %503 = vsyncpa [#allocation3], 1 }
 0x35d   :  { %504 = vsyncpa [#allocation6], 1 }
 0x35e   :  { %505 = vsyncpa [#allocation4], 1 }
 0x35f   :  { %506 = vsyncpa [#allocation9], 1 }

</bundles_post_ra>
